<compile_context>
chip_gen: v7x
topology: tpu7x:2x2x1
jax: 0.10.0
libtpu: 0.0.40
codegen_flags: <defaults>
</compile_context>

<pallas_src>
import numpy as np
import jax
import jax.numpy as jnp
from jax.experimental import pallas as pl
from jax.experimental.pallas import tpu as pltpu

EPS = 1e-5  # nn.BatchNorm2d default


def transition_kernel(x_ref, scale_ref, shift_ref, w_ref, p_ref, o_ref, pooled_ref):
    # x_ref:      (NB*C*H2, 2*W)  rows = (image, channel, h2); lanes = (h parity, w)
    # scale_ref:  (NB*C*H2, 1)    folded BN scale, pre-expanded per row
    # shift_ref:  (NB*C*H2, 1)    folded BN shift, pre-expanded per row
    # w_ref:      (Cout, C)       1x1 conv weight
    # p_ref:      (2*W, W2)       2x2 average-pool matrix (0.25 entries)
    # o_ref:      (NB, Cout, H2*W2)
    # pooled_ref: (NB*C*H2, W2)   VMEM scratch: pooled activations of the block
    nb_images, _, spatial = o_ref.shape
    c_in = w_ref.shape[1]
    w2_size = p_ref.shape[1]
    h2_size = spatial // w2_size

    # Fused inference BatchNorm + ReLU: one dense VPU pass over the whole block.
    y = jnp.maximum(x_ref[...] * scale_ref[...] + shift_ref[...], 0.0)

    # 2x2 average pool of the whole block: ONE MXU matmul (large M = NB*C*H2).
    pooled_ref[...] = jnp.dot(y, p_ref[...], preferred_element_type=jnp.float32)

    # Per image: relayout (c, h2)-rows / w2-lanes -> c-rows / (h2, w2)-lanes via
    # H2 sublane-strided reads + a lane concat, then one lane-dense 1x1-conv
    # matmul and one lane-dense output store.  NB is small (VMEM-budgeted), so
    # this static loop stays compact (single-matmul body, no h2 unrolling).
    w = w_ref[...]
    for nb in range(nb_images):
        base = nb * c_in * h2_size
        p_img = jnp.concatenate(
            [pooled_ref[pl.ds(base + h2, c_in, stride=h2_size), :]
             for h2 in range(h2_size)],
            axis=1)                                                  # (C, H2*W2)
        z = jnp.dot(w, p_img, preferred_element_type=jnp.float32)    # (Cout, H2*W2)
        o_ref[nb] = z.astype(o_ref.dtype)


def _make_pool_matrix(W):
    """(2W, W2) matrix averaging the 2x2 neighbors (h-parity on lanes [0,W)/[W,2W))."""
    W2 = W // 2
    P = np.zeros((2 * W, W2), dtype=np.float32)
    for w2 in range(W2):
        for hp in range(2):
            for wp in range(2):
                P[hp * W + 2 * w2 + wp, w2] = 0.25
    return P


def _images_per_step(N, C, Cout, H, W, budget_bytes=20 << 20):
    """Largest divisor of N whose working set fits the VMEM budget; among those,
    prefer an even grid length >= 2 so both v7x TensorCores get equal work
    (costs at most one extra ~0.35us step on single-TC v5e/v6e)."""
    H2, W2 = H // 2, W // 2

    def est(nb):
        x_blk = nb * C * H * W * 4            # input block (per buffer)
        out_blk = nb * Cout * H2 * W2 * 4     # output block (per buffer)
        pooled = nb * C * H2 * W2 * 4         # scratch
        params = (Cout * C + 2 * W * W2 + 2 * nb * C * H2) * 4
        # 2x double-buffered input + ~1x live BN/ReLU value + 2x output + scratch.
        return 3 * x_blk + 2 * out_blk + pooled + params

    divs = [d for d in range(1, N + 1) if N % d == 0 and est(d) <= budget_bytes]
    if not divs:
        return 1
    even = [d for d in divs if (N // d) >= 2 and (N // d) % 2 == 0]
    return max(even) if even else max(divs)


def transition_forward(x_nchw, gamma, beta, running_mean, running_var, conv_w):
    """Pallas implementation of Transition.forward (eval-mode BN). NCHW in/out."""
    N, C, H, W = x_nchw.shape
    Cout = conv_w.shape[0]
    assert H % 2 == 0 and W % 2 == 0, "even spatial dims expected for 2x2 avg pool"
    H2, W2 = H // 2, W // 2
    CH2 = C * H2

    # Free reshape (no transpose): rows = (n, c, h2), lanes = (h parity, w).
    xr = x_nchw.reshape(N * CH2, 2 * W)

    # Fold BatchNorm (inference) into one scale/shift per flattened row (f32).
    scale = (gamma * jax.lax.rsqrt(running_var + EPS)).astype(jnp.float32)  # (C,)
    shift = (beta - running_mean * scale).astype(jnp.float32)               # (C,)
    scale_rows = jnp.tile(jnp.repeat(scale, H2), N).reshape(N * CH2, 1)
    shift_rows = jnp.tile(jnp.repeat(shift, H2), N).reshape(N * CH2, 1)

    wmat = conv_w[:, :, 0, 0].astype(jnp.float32)                   # (Cout, C)
    pool = jnp.asarray(_make_pool_matrix(W), dtype=jnp.float32)     # (2W, W2)

    NB = _images_per_step(N, C, Cout, H, W)
    if (NB * CH2) % 8 != 0:      # keep the block's sublane dim 8-aligned ...
        NB = N                   # ... full-extent blocks are always legal
    grid = (N // NB,)

    out = pl.pallas_call(
        transition_kernel,
        out_shape=jax.ShapeDtypeStruct((N, Cout, H2 * W2), x_nchw.dtype),
        grid=grid,
        in_specs=[
            pl.BlockSpec((NB * CH2, 2 * W), lambda n: (n, 0)),
            pl.BlockSpec((NB * CH2, 1), lambda n: (n, 0)),
            pl.BlockSpec((NB * CH2, 1), lambda n: (n, 0)),
            pl.BlockSpec((Cout, C), lambda n: (0, 0)),
            pl.BlockSpec((2 * W, W2), lambda n: (0, 0)),
        ],
        out_specs=pl.BlockSpec((NB, Cout, H2 * W2), lambda n: (n, 0, 0)),
        scratch_shapes=[pltpu.VMEM((NB * CH2, W2), jnp.float32)],
        compiler_params=pltpu.CompilerParams(
            dimension_semantics=("parallel",),
            vmem_limit_bytes=40 << 20,
        ),
    )(xr, scale_rows, shift_rows, wmat, pool)

    # Free reshape back to NCHW (N, Cout, H/2, W/2).
    return out.reshape(N, Cout, H2, W2)


def transition_reference(x_nchw, gamma, beta, running_mean, running_var, conv_w):
    """Pure-JAX reference matching PyTorch (eval-mode BN)."""
    b = lambda v: v[None, :, None, None]
    xn = (x_nchw - b(running_mean)) * jax.lax.rsqrt(b(running_var) + EPS)
    xn = xn * b(gamma) + b(beta)
    y = jnp.maximum(xn, 0.0)
    z = jax.lax.conv_general_dilated(
        y, conv_w, window_strides=(1, 1), padding="VALID",
        dimension_numbers=("NCHW", "OIHW", "NCHW"))
    Nz, Co, Hz, Wz = z.shape
    return z.reshape(Nz, Co, Hz // 2, 2, Wz // 2, 2).mean(axis=(3, 5))


if __name__ == "__main__":
    N, C, Cout, H, W = 2, 8, 4, 16, 16   # nChannels=8, nOutChannels=4

    key = jax.random.PRNGKey(0)
    kx, kg, kb, km, kv, kw = jax.random.split(key, 6)

    x = jax.random.normal(kx, (N, C, H, W), dtype=jnp.float32)
    gamma = jax.random.normal(kg, (C,), dtype=jnp.float32) * 0.1 + 1.0
    beta = jax.random.normal(kb, (C,), dtype=jnp.float32) * 0.1
    running_mean = jax.random.normal(km, (C,), dtype=jnp.float32) * 0.1
    running_var = jax.random.uniform(kv, (C,), dtype=jnp.float32, minval=0.5, maxval=1.5)
    conv_w = jax.random.normal(kw, (Cout, C, 1, 1), dtype=jnp.float32) * (1.0 / np.sqrt(C))

    out = jax.block_until_ready(
        transition_forward(x, gamma, beta, running_mean, running_var, conv_w))
    ref = jax.block_until_ready(
        transition_reference(x, gamma, beta, running_mean, running_var, conv_w))

    assert out.shape == (N, Cout, H // 2, W // 2), out.shape
    np.testing.assert_allclose(np.asarray(out), np.asarray(ref), rtol=1e-4, atol=1e-4)
    print("KERNEL_OK")
</pallas_src>

<mosaic_0001>
module attributes {stable_mosaic.version = 11 : i64} {
  func.func @transition_kernel(%arg0: i32, %arg1: memref<64x32xf32, #tpu.memory_space<vmem>>, %arg2: memref<64x1xf32, #tpu.memory_space<vmem>>, %arg3: memref<64x1xf32, #tpu.memory_space<vmem>>, %arg4: memref<4x8xf32, #tpu.memory_space<vmem>>, %arg5: memref<32x8xf32, #tpu.memory_space<vmem>>, %arg6: memref<1x4x64xf32, #tpu.memory_space<vmem>>, %arg7: memref<64x8xf32, #tpu.memory_space<vmem>>) attributes {dimension_semantics = [#tpu.dimension_semantics<parallel>], iteration_bounds = array<i64: 2>, scalar_prefetch = 0 : i64, scratch_operands = 1 : i64, tpu.core_type = #tpu.core_type<tc>, window_params = [{transform_indices = @transform_0, window_bounds = array<i64: 64, 32>}, {transform_indices = @transform_1, window_bounds = array<i64: 64, 1>}, {transform_indices = @transform_2, window_bounds = array<i64: 64, 1>}, {pipeline_mode = #tpu.pipeline_mode<synchronous>, transform_indices = @transform_3, window_bounds = array<i64: 4, 8>}, {pipeline_mode = #tpu.pipeline_mode<synchronous>, transform_indices = @transform_4, window_bounds = array<i64: 32, 8>}, {transform_indices = @transform_5, window_bounds = array<i64: 1, 4, 64>}]} {
    %c0 = arith.constant 0 : index
    %c0_0 = arith.constant 0 : index
    %0 = vector.load %arg1[%c0, %c0_0] : memref<64x32xf32, #tpu.memory_space<vmem>>, vector<64x32xf32>
    %c0_1 = arith.constant 0 : index
    %c0_2 = arith.constant 0 : index
    %1 = vector.load %arg2[%c0_1, %c0_2] : memref<64x1xf32, #tpu.memory_space<vmem>>, vector<64x1xf32>
    %2 = vector.broadcast %1 : vector<64x1xf32> to vector<64x32xf32>
    %3 = arith.mulf %0, %2 : vector<64x32xf32>
    %c0_3 = arith.constant 0 : index
    %c0_4 = arith.constant 0 : index
    %4 = vector.load %arg3[%c0_3, %c0_4] : memref<64x1xf32, #tpu.memory_space<vmem>>, vector<64x1xf32>
    %5 = vector.broadcast %4 : vector<64x1xf32> to vector<64x32xf32>
    %6 = arith.addf %3, %5 : vector<64x32xf32>
    %cst = arith.constant 0.000000e+00 : f32
    %7 = vector.broadcast %cst : f32 to vector<64x32xf32>
    %8 = arith.maximumf %6, %7 : vector<64x32xf32>
    %c0_5 = arith.constant 0 : index
    %c0_6 = arith.constant 0 : index
    %9 = vector.load %arg5[%c0_5, %c0_6] : memref<32x8xf32, #tpu.memory_space<vmem>>, vector<32x8xf32>
    %cst_7 = arith.constant dense<0.000000e+00> : vector<64x8xf32>
    %10 = tpu.matmul %8, %9, %cst_7 {dimension_numbers = #tpu.dot_dimension_numbers<[1], [0], [0], [1], [0, 0, 1, 1], [], []>} : vector<64x32xf32>, vector<32x8xf32>, vector<64x8xf32> -> vector<64x8xf32>
    %c0_8 = arith.constant 0 : index
    %c0_9 = arith.constant 0 : index
    %11 = vector.load %arg7[%c0_8, %c0_9] : memref<64x8xf32, #tpu.memory_space<vmem>>, vector<64x8xf32>
    tpu.vector_store %arg7[%c0_8, %c0_9], %10 {strides = array<i32>} : memref<64x8xf32, #tpu.memory_space<vmem>>, vector<64x8xf32>,
    %c0_10 = arith.constant 0 : index
    %c0_11 = arith.constant 0 : index
    %12 = vector.load %arg4[%c0_10, %c0_11] : memref<4x8xf32, #tpu.memory_space<vmem>>, vector<4x8xf32>
    %c0_12 = arith.constant 0 : index
    %c0_13 = arith.constant 0 : index
    %13 = tpu.strided_load %arg7[%c0_12, %c0_13] {strides = array<i32: 8, 1>} : memref<64x8xf32, #tpu.memory_space<vmem>>, vector<8x8xf32>
    %c1 = arith.constant 1 : index
    %c0_14 = arith.constant 0 : index
    %14 = tpu.strided_load %arg7[%c1, %c0_14] {strides = array<i32: 8, 1>} : memref<64x8xf32, #tpu.memory_space<vmem>>, vector<8x8xf32>
    %c2 = arith.constant 2 : index
    %c0_15 = arith.constant 0 : index
    %15 = tpu.strided_load %arg7[%c2, %c0_15] {strides = array<i32: 8, 1>} : memref<64x8xf32, #tpu.memory_space<vmem>>, vector<8x8xf32>
    %c3 = arith.constant 3 : index
    %c0_16 = arith.constant 0 : index
    %16 = tpu.strided_load %arg7[%c3, %c0_16] {strides = array<i32: 8, 1>} : memref<64x8xf32, #tpu.memory_space<vmem>>, vector<8x8xf32>
    %c4 = arith.constant 4 : index
    %c0_17 = arith.constant 0 : index
    %17 = tpu.strided_load %arg7[%c4, %c0_17] {strides = array<i32: 8, 1>} : memref<64x8xf32, #tpu.memory_space<vmem>>, vector<8x8xf32>
    %c5 = arith.constant 5 : index
    %c0_18 = arith.constant 0 : index
    %18 = tpu.strided_load %arg7[%c5, %c0_18] {strides = array<i32: 8, 1>} : memref<64x8xf32, #tpu.memory_space<vmem>>, vector<8x8xf32>
    %c6 = arith.constant 6 : index
    %c0_19 = arith.constant 0 : index
    %19 = tpu.strided_load %arg7[%c6, %c0_19] {strides = array<i32: 8, 1>} : memref<64x8xf32, #tpu.memory_space<vmem>>, vector<8x8xf32>
    %c7 = arith.constant 7 : index
    %c0_20 = arith.constant 0 : index
    %20 = tpu.strided_load %arg7[%c7, %c0_20] {strides = array<i32: 8, 1>} : memref<64x8xf32, #tpu.memory_space<vmem>>, vector<8x8xf32>
    %21 = tpu.concatenate %13, %14, %15, %16, %17, %18, %19, %20 in 1 : vector<8x8xf32>, vector<8x8xf32>, vector<8x8xf32>, vector<8x8xf32>, vector<8x8xf32>, vector<8x8xf32>, vector<8x8xf32>, vector<8x8xf32> -> vector<8x64xf32>
    %cst_21 = arith.constant dense<0.000000e+00> : vector<4x64xf32>
    %22 = tpu.matmul %12, %21, %cst_21 {dimension_numbers = #tpu.dot_dimension_numbers<[1], [0], [0], [1], [0, 0, 1, 1], [], []>} : vector<4x8xf32>, vector<8x64xf32>, vector<4x64xf32> -> vector<4x64xf32>
    %c0_22 = arith.constant 0 : index
    %c0_23 = arith.constant 0 : index
    %c0_24 = arith.constant 0 : index
    %23 = vector.load %arg6[%c0_22, %c0_23, %c0_24] : memref<1x4x64xf32, #tpu.memory_space<vmem>>, vector<1x4x64xf32>
    %24 = vector.shape_cast %23 : vector<1x4x64xf32> to vector<4x64xf32>
    %25 = vector.shape_cast %22 : vector<4x64xf32> to vector<1x4x64xf32>
    tpu.vector_store %arg6[%c0_22, %c0_23, %c0_24], %25 {strides = array<i32>} : memref<1x4x64xf32, #tpu.memory_space<vmem>>, vector<1x4x64xf32>,
    return
  }
  func.func @transform_0(%arg0: i32) -> (i32, i32) {
    %c0_i32 = arith.constant 0 : i32
    %c0_i32_0 = arith.constant 0 : i32
    return %arg0, %c0_i32 : i32, i32
  }
  func.func @transform_1(%arg0: i32) -> (i32, i32) {
    %c0_i32 = arith.constant 0 : i32
    %c0_i32_0 = arith.constant 0 : i32
    return %arg0, %c0_i32 : i32, i32
  }
  func.func @transform_2(%arg0: i32) -> (i32, i32) {
    %c0_i32 = arith.constant 0 : i32
    %c0_i32_0 = arith.constant 0 : i32
    return %arg0, %c0_i32 : i32, i32
  }
  func.func @transform_3(%arg0: i32) -> (i32, i32) {
    %c0_i32 = arith.constant 0 : i32
    %c0_i32_0 = arith.constant 0 : i32
    %c0_i32_1 = arith.constant 0 : i32
    return %c0_i32, %c0_i32_0 : i32, i32
  }
  func.func @transform_4(%arg0: i32) -> (i32, i32) {
    %c0_i32 = arith.constant 0 : i32
    %c0_i32_0 = arith.constant 0 : i32
    %c0_i32_1 = arith.constant 0 : i32
    return %c0_i32, %c0_i32_0 : i32, i32
  }
  func.func @transform_5(%arg0: i32) -> (i32, i32, i32) {
    %c0_i32 = arith.constant 0 : i32
    %c0_i32_0 = arith.constant 0 : i32
    %c0_i32_1 = arith.constant 0 : i32
    return %arg0, %c0_i32, %c0_i32_0 : i32, i32, i32
  }
}

</mosaic_0001>

<bundles_post_ra>
// kernel: tpu_custom_call.1
= control target key start
LH: loop header
LB: loop body
LE: loop exit
PB: predicated region body
PF: predicated region fallthrough
CT: control target
= control target key end

     0   :  { %10 = vsyncpa [#allocation4], 0  ;;  %s1189_s0 = inlined_call_operand.vmem [shape: f32[128,32], index: 0, kind: input, shape index: {}]   ;;  %s1190_s1 = inlined_call_operand.vmem [shape: f32[128,1], index: 1, kind: input, shape index: {}]   ;;  %s1191_s2 = inlined_call_operand.vmem [shape: f32[128,1], index: 2, kind: input, shape index: {}]   ;;  %s1192_s3 = inlined_call_operand.vmem [shape: f32[4,8], index: 3, kind: input, shape index: {}]   ;;  %s1193_s4 = inlined_call_operand.vmem [shape: f32[32,8], index: 4, kind: input, shape index: {}]   ;;  %s1194_s5 = inlined_call_operand.hbm [shape: f32[2,4,64], index: 5, kind: output, shape index: {}]  }
   0x1   :  { %12 = vsyncpa [#allocation4 + $0x1], 0  ;;  %s1015_s18 = smov 0   ;;  %s1017_s19 = smov 0  }
   0x2   :  { %s1019_s20 = smov 0   ;;  %s1021_s21 = smov 0  }
   0x3 LB: > { %s1036_s22 = sadd.s32 4294967295, %s972_s21   ;;  %s784_s23 = sadd.s32 4294967294, %s972_s21   ;;  %s972_s21 = sphi %s1021_s21, %s1200_s21   ;;  %s968_s20 = sphi %s1019_s20, %s1199_s20   ;;  %s964_s19 = sphi %s1017_s19, %s1198_s19   ;;  %s960_s18 = sphi %s1015_s18, %s1197_s18  }
   0x4   : > { %s1040_s24 = sadd.s32 1, %s972_s21   ;;  %s145_s25 = sadd.s32 1, %s968_s20 }
   0x5   : > { %s142_s26 = ssub.s32 %s972_s21, %s1040_s24  ;;  %p155_p0 = scmp.ne.s32.totalorder %s968_s20, %s964_s19 }
   0x6   : > { %p143_p1 = scmp.eq.s32.totalorder %s142_s26, 0  ;;  %p156_p2 = scmp.eq.s32.totalorder %s1036_s22, 1 }
   0x7   : > { %p161_p3 = scmp.ne.s32.totalorder %s964_s19, %s960_s18  ;;  %p162_p4 = scmp.eq.s32.totalorder %s784_s23, 1 }
   0x8   : > { %s1051_s27 = scalar_select %p143_p1, %s968_s20, %s145_s25  }
   0x9   : > { %p1053_p5 = por %p156_p2, %p155_p0  ;;  %p1057_p6 = por %p162_p4, %p161_p3 }
   0xa   : > { %p787_p7 = scmp.ge.s32.totalorder %s972_s21, 1  ;;  %p213_p8 = scmp.lt.s32.totalorder %s972_s21, 3 }
   0xc   : > { %p214_p9 = pnand %p787_p7, %p213_p8 }
   0xd   : > { %s789_s30 = sshll.u32 (!%p214_p9), %s1036_s22, 3  ;;  %v974_v0 = vmov (!%p214_p9), 0   ;;  %v397_v6 = vld [vmem:[%s1193_s4] sm:$0xff] (!%p214_p9)  ;;  %v398_v8 = vld [vmem:[%s1193_s4 + $0x8] sm:$0xff] (!%p214_p9)  ;;  %v399_v9 = vld [vmem:[%s1193_s4 + $0x10] sm:$0xff] (!%p214_p9)  ;;  %vm401_vm0 = vcmask (!%p214_p9), 261120  }
   0xe   : > { %217 = sbr.rel (%p214_p9) target bundleno = 764 (0x2fc), region = 40  ;;  %909 = vset.pattern.permute.xlu1 (!%p214_p9), %v974_v0  ;;  %908 = vset.pattern.permute.xlu0 (!%p214_p9), %v974_v0  ;;  %p252_p10 = scmp.lt.s32.totalorder (!%p214_p9), %s789_s30, 15  ;;  %v847_v10 = vpack.c.bf16 (!%p214_p9), %v398_v8, %v397_v6  ;;  %v400_v11 = vld [vmem:[%s1193_s4 + $0x18] sm:$0xff] (!%p214_p9)  ;;  %vm531_vm1 = vcmask (!%p214_p9), 64512   ;;  %vm978_vm2 = vmmov (!%p214_p9), 0   ;;  %vm601_vm3 = vcmask (!%p214_p9), 130048  }
   0xf   : > { %v851_v12 = vpack.c.bf16 (!%p214_p9), %v400_v11, %v399_v9  ;;  %s979_s10 = smov (!%p214_p9), 32   ;;  %s980_s11 = smov (!%p214_p9), 24   ;;  %vm603_vm4 = vcmask (!%p214_p9), 195584   ;;  %vm606_vm5 = vcmask (!%p214_p9), 326656   ;;  %vm608_vm6 = vcmask (!%p214_p9), 392192  }
  0x10   : > { %848 = vmatprep.subr.bf16.mxu0 (!%p214_p9), %v847_v10  ;;  %855 = vmatprep.subr.bf16.mxu1 (!%p214_p9), %v847_v10  ;;  %s982_s13 = smov (!%p214_p9), 40   ;;  %s983_s14 = smov (!%p214_p9), 56   ;;  %vm610_vm7 = vcmask (!%p214_p9), 457728   ;;  %vm685_vm8 = vcmask (!%p214_p9), 519168  }
  0x11   : > { %850 = vmatpush3.bf16.msra.mxu0 (!%p214_p9), %v847_v10  ;;  %857 = vmatpush3.bf16.msra.mxu1 (!%p214_p9), %v847_v10  ;;  %s248_s17 = sand.u32 (!%p214_p9), 1, %s964_s19   ;;  %s805_s25 = sshll.u32 (!%p214_p9), %s1036_s22, 6 }
  0x12   : > { %852 = vmatprep.subr.bf16.mxu0 (!%p214_p9), %v851_v12  ;;  %856 = vmatprep.subr.bf16.mxu1 (!%p214_p9), %v851_v12  ;;  %s788_s23 = sshll.u32 (!%p214_p9), %s248_s17, 2  ;;  %s984_s22 = smov (!%p214_p9), [#allocation3]  }
  0x13   : > { %s250_s26 = scalar_lea.vmem (!%p214_p9), [#allocation3], %s788_s23 }
  0x15   : > { %s1202_s30 = smov (!%p252_p10, %s789_s30), 15  ;;  %854 = vmatpush3.bf16.msra.mxu0 %v851_v12  ;;  %858 = vmatpush3.bf16.msra.mxu1 %v851_v12 }
  0x16   : > { %s1064_s6 = sshll.u32 %s1202_s30, 3  ;;  %s701_s30 = sshll.u32 %s250_s26, 4  ;;  %s1149_s30 = int_to_ptr.vmem [resolvable:$true] %s701_s30 }
  0x17   : > { %s1070_s9 = scalar_lea.vmem %s1191_s2, %s1064_s6  ;;  %s1076_s12 = scalar_lea.vmem %s1190_s1, %s1064_s6 }
  0x18   : > { %v333_v1 = vld [vmem:[%s1070_s9] sm:$0xff]  ;;  %v334_v3 = vld [vmem:[%s1070_s9 + $0x8] sm:$0xff]  ;;  %v280_v5 = vld [vmem:[%s1076_s12 + $0x18] sm:$0xff]  ;;  %s1110_s8 = scalar_lea.vmem %s1189_s0, %s1064_s6  ;;  %s975_s6 = smov 16  }
  0x19   : > { %v277_v2 = vld [vmem:[%s1076_s12] sm:$0xff]  ;;  %343 = vperm.xlu1 %909, %v333_v1   ;;  %v278_v4 = vld [vmem:[%s1076_s12 + $0x8] sm:$0xff]  ;;  %v279_v7 = vld [vmem:[%s1076_s12 + $0x10] sm:$0xff] }
  0x1a   : > { %287 = vperm.xlu0 %908, %v277_v2   ;;  %v336_v13 = vld [vmem:[%s1070_s9 + $0x18] sm:$0xff]  ;;  %v335_v14 = vld [vmem:[%s1070_s9 + $0x10] sm:$0xff]  ;;  %v281_v16 = vld [vmem:[%s1076_s12 + $0x20] sm:$0xff] }
  0x1b   : > { %v283_v15 = vld [vmem:[%s1076_s12 + $0x30] sm:$0xff]  ;;  %v284_v17 = vld [vmem:[%s1076_s12 + $0x38] sm:$0xff]  ;;  %v282_v18 = vld [vmem:[%s1076_s12 + $0x28] sm:$0xff]  ;;  %s981_s12 = smov 48  }
  0x1c   : > { %v339_v19 = vld [vmem:[%s1070_s9 + $0x30] sm:$0xff]  ;;  %v337_v20 = vld [vmem:[%s1070_s9 + $0x20] sm:$0xff]  ;;  %v340_v21 = vld [vmem:[%s1070_s9 + $0x38] sm:$0xff] }
  0x1d   : > { %348 = vperm.xlu1 %909, %v334_v3   ;;  %v338_v22 = vld [vmem:[%s1070_s9 + $0x28] sm:$0xff]  ;;  %v269_v23 = vld [vmem:[%s1110_s8] sm:$0xff]  ;;  %v272_v35 = vld [vmem:[%s1110_s8 + $0x18] sm:$0xff]  ;;  %s976_s9 = smov 8  }
  0x1e   : > { %292 = vperm.xlu0 %908, %v278_v4   ;;  %v270_v27 = vld [vmem:[%s1110_s8 + $0x8] sm:$0xff]  ;;  %v271_v37 = vld [vmem:[%s1110_s8 + $0x10] sm:$0xff]  ;;  %v273_v50 = vld [vmem:[%s1110_s8 + $0x20] sm:$0xff] }
  0x1f   : > { %v275_v49 = vld [vmem:[%s1110_s8 + $0x30] sm:$0xff]  ;;  %v276_v55 = vld [vmem:[%s1110_s8 + $0x38] sm:$0xff]  ;;  %v274_v56 = vld [vmem:[%s1110_s8 + $0x28] sm:$0xff] }
  0x21   : > { %302 = vperm.xlu1 %909, %v280_v5  }
  0x22   : > { %297 = vperm.xlu0 %908, %v279_v7  }
  0x25   : > { %358 = vperm.xlu1 %909, %v336_v13  }
  0x26   : > { %353 = vperm.xlu0 %908, %v335_v14  }
  0x29   : > { %317 = vperm.xlu1 %909, %v283_v15  }
  0x2a   : > { %307 = vperm.xlu0 %908, %v281_v16  }
  0x2d   : > { %322 = vperm.xlu1 %909, %v284_v17  }
  0x2e   : > { %312 = vperm.xlu0 %908, %v282_v18  }
  0x31   : > { %373 = vperm.xlu1 %909, %v339_v19  }
  0x32   : > { %363 = vperm.xlu0 %908, %v337_v20  }
  0x35   : > { %378 = vperm.xlu1 %909, %v340_v21  }
  0x36   : > { %368 = vperm.xlu0 %908, %v338_v22  }
  0x98   : > { %v344_v24 = vpop.permute.xlu1 %343 }
  0x99   : > { %v288_v25 = vpop.permute.xlu0 %287 }
  0x9a   : > { %v325_v26 = vmul.f32 %v288_v25, %v269_v23 }
  0x9c   : > { %v381_v28 = vadd.f32 %v344_v24, %v325_v26  ;;  %v349_v29 = vpop.permute.xlu1 %348 }
  0x9d   : > { %v293_v30 = vpop.permute.xlu0 %292 }
  0x9e   : > { %v326_v31 = vmul.f32 %v293_v30, %v270_v27  ;;  %v389_v32 = vmax.f32 %v381_v28, 0.0  ;;  %v977_v27 = vmov 0.0  }
  0x9f   : > { %842 = vmatprep.subr.mxu1 %v977_v27 }
  0xa0   : > { %v382_v33 = vadd.f32 %v349_v29, %v326_v31  ;;  %830 = vmatprep.mubr.msk.f32.mxu0 %vm401_vm0, %v389_v32  ;;  %v303_v34 = vpop.permute.xlu1 %302 }
  0xa1   : > { %v298_v36 = vpop.permute.xlu0 %297  ;;  %v328_v39 = vmul.f32 %v303_v34, %v272_v35 }
  0xa2   : > { %v390_v38 = vmax.f32 %v382_v33, 0.0  ;;  %v327_v40 = vmul.f32 %v298_v36, %v271_v37 }
  0xa4   : > { %831 = vmatmul.mubr.msk.f32.vlgmr.msra.gmra.mrb[0].mxu0 %vm401_vm0, %v390_v38  ;;  %v359_v41 = vpop.permute.xlu1 %358 }
  0xa5   : > { %v354_v42 = vpop.permute.xlu0 %353  ;;  %v384_v43 = vadd.f32 %v359_v41, %v328_v39 }
  0xa6   : > { %v383_v44 = vadd.f32 %v354_v42, %v327_v40 }
  0xa7   : > { %v392_v45 = vmax.f32 %v384_v43, 0.0 }
  0xa8   : > { %v391_v46 = vmax.f32 %v383_v44, 0.0  ;;  %v318_v47 = vpop.permute.xlu1 %317 }
  0xa9   : > { %v308_v48 = vpop.permute.xlu0 %307  ;;  %v331_v53 = vmul.f32 %v318_v47, %v275_v49 }
  0xaa   : > { %833 = vmatprep.mubr.msk.f32.mxu0 %vm401_vm0, %v391_v46  ;;  %v329_v54 = vmul.f32 %v308_v48, %v273_v50 }
  0xab   : > { %834 = vmatmul.mubr.msk.f32.gmra.mrb[2].mxu0 %vm401_vm0, %v392_v45 }
  0xac   : > { %v323_v51 = vpop.permute.xlu1 %322 }
  0xad   : > { %v313_v52 = vpop.permute.xlu0 %312  ;;  %v332_v61 = vmul.f32 %v323_v51, %v276_v55 }
  0xae   : > { %v330_v62 = vmul.f32 %v313_v52, %v274_v56 }
  0xb0   : > { %v374_v57 = vpop.permute.xlu1 %373 }
  0xb1   : > { %v364_v58 = vpop.permute.xlu0 %363  ;;  %v387_v59 = vadd.f32 %v374_v57, %v331_v53  ;;  %v540_v53 = vld [vmem:[%s1192_s3] sm:$0xf] }
  0xb2   : > { %v385_v60 = vadd.f32 %v364_v58, %v329_v54 }
  0xb3   : > { %v395_v63 = vmax.f32 %v387_v59, 0.0 }
  0xb4   : > { %v393_v0 = vmax.f32 %v385_v60, 0.0  ;;  %v379_v1 = vpop.permute.xlu1 %378 }
  0xb5   : > { %v369_v2 = vpop.permute.xlu0 %368  ;;  %v388_v3 = vadd.f32 %v379_v1, %v332_v61  ;;  %839 = vmatprep.mubr.msk.f32.mxu1 %vm401_vm0, %v395_v63 }
  0xb6   : > { %v386_v4 = vadd.f32 %v369_v2, %v330_v62  ;;  %836 = vmatprep.mubr.msk.f32.mxu0 %vm401_vm0, %v393_v0 }
  0xb7   : > { %v396_v5 = vmax.f32 %v388_v3, 0.0 }
  0xb8   : > { %v394_v6 = vmax.f32 %v386_v4, 0.0 }
  0xb9   : > { %840 = vmatmul.mubr.msk.f32.vlgmr.msra.gmra.mrb[0].mxu1 %vm401_vm0, %v396_v5 }
  0xba   : > { %837 = vmatmul.mubr.msk.f32.gmra.mrb[4].mxu0 %vm401_vm0, %v394_v6  ;;  %844 = vmatprep.mubr.msk.f32.mxu1 %vm978_vm2, %v977_v27 }
 0x177   : > { %v832_v7 = vpop.f32.mrb[0].mxu0 }
 0x178   : > { %533 = vst.msk [vmem:[#allocation2 + $0x8] sm:$0xff] %vm531_vm1, %v832_v7  ;;  %v492_v8 = vpop.f32.mrb[1].mxu0 }
 0x179   : > { %532 = vst.msk [vmem:[#allocation2] sm:$0xff] %vm531_vm1, %v492_v8 }
 0x17e   : > { %v835_v9 = vpop.f32.mrb[2].mxu0 }
 0x17f   : > { %535 = vst.msk [vmem:[#allocation2 + $0x18] sm:$0xff] %vm531_vm1, %v835_v9  ;;  %v502_v10 = vpop.f32.mrb[3].mxu0 }
 0x180   : > { %534 = vst.msk [vmem:[#allocation2 + $0x10] sm:$0xff] %vm531_vm1, %v502_v10 }
 0x187   : > { %v549_v15 = vld [vmem:[#allocation2 + $0x2] ss:$8 sm:$0xf]  ;;  %v545_v16 = vld [vmem:[#allocation2 + $0x1] ss:$8 sm:$0xf] }
 0x188   : > { %v557_v23 = vld [vmem:[#allocation2 + $0x4] ss:$8 sm:$0xf]  ;;  %v553_v24 = vld [vmem:[#allocation2 + $0x3] ss:$8 sm:$0xf] }
 0x189   : > { %v565_v30 = vld [vmem:[#allocation2 + $0x6] ss:$8 sm:$0xf]  ;;  %v561_v31 = vld [vmem:[#allocation2 + $0x5] ss:$8 sm:$0xf] }
 0x18a   : > { %v569_v35 = vld [vmem:[#allocation2 + $0x7] ss:$8 sm:$0xf]  ;;  %v541_v38 = vld [vmem:[#allocation2] ss:$8 sm:$0xf] }
 0x18c   : > { %v841_v12 = vpop.f32.mrb[0].mxu1 }
 0x18d   : > { %v838_v11 = vpop.f32.mrb[4].mxu0  ;;  %539 = vst.msk [vmem:[#allocation2 + $0x38] sm:$0xff] %vm531_vm1, %v841_v12  ;;  %v522_v14 = vpop.f32.mrb[1].mxu1 }
 0x18e   : > { %537 = vst.msk [vmem:[#allocation2 + $0x28] sm:$0xff] %vm531_vm1, %v838_v11  ;;  %v512_v13 = vpop.f32.mrb[5].mxu0  ;;  %538 = vst.msk [vmem:[#allocation2 + $0x30] sm:$0xff] %vm531_vm1, %v522_v14 }
 0x18f   : > { %536 = vst.msk [vmem:[#allocation2 + $0x20] sm:$0xff] %vm531_vm1, %v512_v13 }
 0x196   : > { %v550_v17 = vld [vmem:[#allocation2 + $0x2] ss:$8 sm:$0xf0]  ;;  %v546_v18 = vld [vmem:[#allocation2 + $0x1] ss:$8 sm:$0xf0] }
 0x197   : > { %v551_v19 = vor.u32 %v550_v17, %v549_v15  ;;  %v547_v20 = vor.u32 %v546_v18, %v545_v16  ;;  %v558_v21 = vld [vmem:[#allocation2 + $0x4] ss:$8 sm:$0xf0]  ;;  %v554_v22 = vld [vmem:[#allocation2 + $0x3] ss:$8 sm:$0xf0] }
 0x198   : > { %v559_v25 = vor.u32 %v558_v21, %v557_v23  ;;  %v555_v26 = vor.u32 %v554_v22, %v553_v24  ;;  %v566_v28 = vld [vmem:[#allocation2 + $0x6] ss:$8 sm:$0xf0]  ;;  %v562_v29 = vld [vmem:[#allocation2 + $0x5] ss:$8 sm:$0xf0] }
 0x199   : > { %577 = vrot.lane.b32.xlu1 %v551_v19, %s975_s6  ;;  %573 = vrot.lane.b32.xlu0 %v547_v20, %s976_s9  ;;  %v567_v32 = vor.u32 %v566_v28, %v565_v30  ;;  %v563_v33 = vor.u32 %v562_v29, %v561_v31  ;;  %v570_v34 = vld [vmem:[#allocation2 + $0x7] ss:$8 sm:$0xf0]  ;;  %v542_v37 = vld [vmem:[#allocation2] ss:$8 sm:$0xf0]  ;;  %s1147_s6 = scalar_lea.hbm %s1194_s5, %s805_s25 }
 0x19a   : > { %v571_v36 = vor.u32 %v570_v34, %v569_v35  ;;  %v543_v39 = vor.u32 %v542_v37, %v541_v38  ;;  %s688_s9 = scalar_lea.sflag [#allocation4], %s248_s17 }
 0x19d   : > { %585 = vrot.lane.b32.xlu1 %v559_v25, %s979_s10  ;;  %581 = vrot.lane.b32.xlu0 %v555_v26, %s980_s11  ;;  %s910_s10 = scalar_lea.vmem %s1149_s30, 64  ;;  %s914_s11 = sshll.u32 %s984_s22, 4  ;;  %s915_s11 = int_to_ptr.vmem [resolvable:$false] %s914_s11 }
 0x19e   : > { %p911_p11 = scmp.ne.s32.totalorder %s1149_s30, %s910_s10  ;;  %p917_p0 = scmp.lt.s32.totalorder %s1149_s30, %s915_s11 }
 0x1a0   : > { %p912_p12 = pnand %p911_p11, %p1053_p5 }
 0x1a1   : > { %593 = vrot.lane.b32.xlu1 %v567_v32, %s981_s12  ;;  %589 = vrot.lane.b32.xlu0 %v563_v33, %s982_s13  ;;  %s916_s12 = scalar_lea.vmem %s915_s11, 128 }
 0x1a2   : > { %p913_p13 = pneg %p912_p12  ;;  %p918_p1 = scmp.lt.s32.totalorder %s916_s12, %s910_s10 }
 0x1a4   : > { %p919_p2 = por %p918_p1, %p917_p0 }
 0x1a5   : > { %597 = vrot.lane.b32.xlu0 %v571_v36, %s983_s14 }
 0x1a6   : > { %p920_p3 = pnand %p919_p2, %p913_p13 }
 0x20b   : > { %v578_v40 = vpop.permute.xlu1 %577  ;;  %v574_v41 = vpop.permute.xlu0 %573 }
 0x20c   : > { %v600_v42 = vsel %vm531_vm1, %v543_v39, %v574_v41 }
 0x20d   : > { %v602_v45 = vsel %vm601_vm3, %v600_v42, %v578_v40 }
 0x20f   : > { %v586_v43 = vpop.permute.xlu1 %585  ;;  %v582_v44 = vpop.permute.xlu0 %581 }
 0x210   : > { %v604_v46 = vsel %vm603_vm4, %v602_v45, %v582_v44 }
 0x211   : > { %v605_v48 = vsel %vm401_vm0, %v604_v46, %v586_v43 }
 0x213   : > { %v590_v47 = vpop.permute.xlu0 %589  ;;  %v594_v49 = vpop.permute.xlu1 %593 }
 0x214   : > { %v607_v50 = vsel %vm606_vm5, %v605_v48, %v590_v47 }
 0x215   : > { %v609_v52 = vsel %vm608_vm6, %v607_v50, %v594_v49 }
 0x217   : > { %v598_v51 = vpop.permute.xlu0 %597 }
 0x218   : > { %v611_v54 = vsel %vm610_vm7, %v609_v52, %v598_v51 }
 0x219   : > { %843 = vmatpush3.msra.mxu1 %v611_v54 }
 0x21a   : > { %845 = vmatmul.mubr.msk.f32.vlgmr.msra.gmra.mrb[2].mxu1 %vm531_vm1, %v540_v53 }
 0x2ed   : > { %v681_v55 = vpop.f32.mrb[2].mxu1 }
 0x2ee   : > { %686 = vst.msk [vmem:[%s250_s26] sm:$0xf] %vm685_vm8, %v681_v55  ;;  %v846_v56 = vpop.f32.mrb[3].mxu1 }
 0x2ef   : > { %923 = shalt.err (!%p920_p3)
}
 0x2f0   : > { %s924_s13 = scalar_lea.hbm %s1147_s6, 64  ;;  %s928_s16 = scalar_lea.hbm %s1194_s5, 128 }
 0x2f1   : > { %p925_p4 = scmp.ne.s32.totalorder %s1147_s6, %s924_s13  ;;  %p929_p9 = scmp.lt.u32.totalorder %s1147_s6, %s1194_s5 }
 0x2f2   : > { %p930_p10 = scmp.lt.u32.totalorder %s928_s16, %s924_s13  ;;  %p932_p12 = scmp.lt.u32.totalorder %s924_s13, %s1147_s6 }
 0x2f3   : > { %p926_p7 = pnand %p925_p4, %p1053_p5 }
 0x2f4   : > { %p931_p11 = por %p930_p10, %p929_p9 }
 0x2f5   : > { %p927_p8 = pneg %p926_p7 }
 0x2f6   : > { %p933_p13 = por %p932_p12, %p931_p11 }
 0x2f8   : > { %p934_p0 = pnand %p933_p13, %p927_p8 }
 0x2fa   : > { %937 = shalt.err (!%p934_p0)
}
 0x2fb   : > { %859 = dma.vmem_to_hbm [thread:$0]  (%p1053_p5), %s1149_s30, 64, %s1147_s6, %s688_s9  }
 0x2fc PF: > { %p865_p1 = scmp.ge.s32.totalorder %s972_s21, 2  ;;  %s713_s25 = sand.u32 1, %s960_s18  }
 0x2fd   : > { %s714_s26 = scalar_lea.sflag [#allocation4], %s713_s25 }
 0x2fe   : > { %p862_p2 = pnand %p865_p1, %p1057_p6 }
 0x300   : > { %955 = dma.done.wait (!%p862_p2), %s714_s26, 64  }
 0x301   : > { %957 = vsyncadd (!%p862_p2), %s714_s26, 4294967232  ;;  %p15_p3 = scmp.ge.s32.totalorder %s1040_s24, 4   ;;  %s1197_s18 = smov %s964_s19 }
 0x302   : > { %s1198_s19 = smov %s968_s20  ;;  %s1199_s20 = smov %s1051_s27 }
 0x303   : > { %s1200_s21 = smov %s1040_s24  ;;  %17 = sbr.rel (!%p15_p3) target bundleno = 3 (0x3), region = 88 }
 0x30a   :  { %719 = vsyncpa [#allocation4], 1 }
 0x30b   :  { %721 = vsyncpa [#allocation4 + $0x1], 1 }

</bundles_post_ra>
